<compile_context>
chip_gen: v7x
topology: tpu7x:2x2x1
jax: 0.10.0
libtpu: 0.0.40
codegen_flags: <defaults>
</compile_context>

<pallas_src>
import jax
import jax.numpy as jnp
from jax.experimental import pallas as pl
from jax.experimental.pallas import tpu as pltpu


def _round_up(x, m):
    return ((x + m - 1) // m) * m


def _prenorm_fn_kernel(x_ref, g_ref, beta_ref, w_ref, bias_ref, o_ref):
    """LayerNorm over last dim (f32 stats, two-pass var), then y = xn @ W + b."""
    x = x_ref[...].astype(jnp.float32)                         # (TR, D)
    d = x.shape[-1]
    inv_d = jnp.float32(1.0 / d)

    mean = jnp.sum(x, axis=-1, keepdims=True) * inv_d           # (TR, 1)
    xc = x - mean
    var = jnp.sum(xc * xc, axis=-1, keepdims=True) * inv_d      # biased var (torch)
    inv = jax.lax.rsqrt(var + 1e-5)

    xn = xc * inv * g_ref[...] + beta_ref[...]                  # (TR, D), f32

    # MXU matmul in the weight's dtype (bf16 recommended), f32 accumulation.
    y = jnp.dot(xn.astype(w_ref.dtype), w_ref[...],
                preferred_element_type=jnp.float32)             # (TR, D_out)
    y = y + bias_ref[...]
    o_ref[...] = y.astype(o_ref.dtype)


def prenorm_linear(x, gamma, beta, w, bias, *, block_rows=512):
    """x: (B, N, D) -> (B, N, D_out); LayerNorm(D) then Linear(D, D_out).

    The matmul runs in w.dtype (pass bf16 weights for the fast MXU path);
    LN statistics and accumulation stay in f32.  Pass bf16 x to get bf16
    output and halve the HBM streams (kernel is bandwidth-bound).
    """
    B, N, D = x.shape
    D_out = w.shape[1]
    R = B * N
    xf = x.reshape(R, D)            # free reshape (no HBM pass)

    # Row tile: multiple of 8 (f32 sublane), capped by (rounded-up) R.
    br = _round_up(max(8, int(block_rows)), 8)
    br = min(br, _round_up(R, 8))
    # Keep the grid long enough (>= ~8 steps) that the DMA pipeline overlaps
    # and both v7x TensorCores get work; harmless on 1-TC v5e/v6e.
    min_steps = 8
    while br > 64 and pl.cdiv(R, br) < min_steps:
        br = _round_up(br // 2, 8)

    grid = (pl.cdiv(R, br),)        # partial last tile -> masked writeback

    g2 = gamma.reshape(1, D).astype(jnp.float32)
    b2 = beta.reshape(1, D).astype(jnp.float32)
    bias2 = bias.reshape(1, D_out).astype(jnp.float32)

    out_dtype = x.dtype
    x_bytes = jnp.dtype(xf.dtype).itemsize
    w_bytes = jnp.dtype(w.dtype).itemsize
    o_bytes = jnp.dtype(out_dtype).itemsize

    # VMEM budget: double-buffered x/out tiles + single-buffered resident
    # weight + small params; 2x headroom, clipped per-generation (v7x: 64 MiB
    # physical; v5e/v6e: 128 MiB).
    vmem_est = (2 * br * D * x_bytes
                + 2 * br * D_out * o_bytes
                + D * D_out * w_bytes
                + 4 * (2 * D + 2 * D_out) * 4)
    try:
        vmem_cap = int(pltpu.get_tpu_info().vmem_capacity_bytes)
    except Exception:
        vmem_cap = 64 * 1024 * 1024
    vmem_limit = int(min(max(2 * vmem_est, 16 * 1024 * 1024), vmem_cap // 2))

    cost = pl.CostEstimate(
        flops=2 * R * D * D_out + 7 * R * D,
        transcendentals=R,  # one rsqrt per row
        bytes_accessed=(R * D * x_bytes
                        + D * D_out * w_bytes
                        + R * D_out * o_bytes),
    )

    resident = pl.Buffered(1)       # index never changes -> single buffer

    out = pl.pallas_call(
        _prenorm_fn_kernel,
        out_shape=jax.ShapeDtypeStruct((R, D_out), out_dtype),
        grid_spec=pltpu.PrefetchScalarGridSpec(
            num_scalar_prefetch=0,
            grid=grid,
            in_specs=[
                # x row tile (double-buffered stream).  If a trace ever shows
                # exposed DMA, try pipeline_mode=pl.Buffered(3) here.
                pl.BlockSpec((br, D), lambda i: (i, 0)),
                pl.BlockSpec((1, D), lambda i: (0, 0), pipeline_mode=resident),      # gamma
                pl.BlockSpec((1, D), lambda i: (0, 0), pipeline_mode=resident),      # beta
                pl.BlockSpec((D, D_out), lambda i: (0, 0), pipeline_mode=resident),  # W
                pl.BlockSpec((1, D_out), lambda i: (0, 0), pipeline_mode=resident),  # bias
            ],
            out_specs=pl.BlockSpec((br, D_out), lambda i: (i, 0)),
        ),
        compiler_params=pltpu.CompilerParams(
            dimension_semantics=("parallel",),
            vmem_limit_bytes=vmem_limit),
        cost_estimate=cost,
    )(xf, g2, b2, w, bias2)

    return out.reshape(B, N, D_out)


def prenorm_linear_ref(x, gamma, beta, w, bias):
    """Plain-JAX reference mirroring torch LayerNorm + Linear (all f32)."""
    xf = x.astype(jnp.float32)
    mean = jnp.mean(xf, axis=-1, keepdims=True)
    var = jnp.mean((xf - mean) ** 2, axis=-1, keepdims=True)
    xn = (xf - mean) / jnp.sqrt(var + 1e-5) * gamma + beta
    return xn @ w.astype(jnp.float32) + bias


if __name__ == "__main__":
    key = jax.random.PRNGKey(0)
    # Small ViT-like shapes: N = 197 tokens (CLS + 14x14), lane-dense D = 128.
    B, N, D = 2, 197, 128
    D_out = D

    k_x, k_w, k_b = jax.random.split(key, 3)
    x = jax.random.normal(k_x, (B, N, D), dtype=jnp.float32)

    # LayerNorm params: torch default init (weight=1, bias=0).
    gamma = jnp.ones((D,), dtype=jnp.float32)
    beta = jnp.zeros((D,), dtype=jnp.float32)

    # fn = Linear(D, D_out): deterministic synthetic params.
    # TODO(synk): `fn` is an arbitrary injected module in the original code;
    # a Linear layer is fused here as a representative instantiation.
    w_f32 = jax.random.normal(k_w, (D, D_out), dtype=jnp.float32) * 0.02
    bias = jax.random.normal(k_b, (D_out,), dtype=jnp.float32) * 0.02

    # f32 path: tight correctness check (R=394, partial last tile exercised).
    y_ref = prenorm_linear_ref(x, gamma, beta, w_f32, bias)
    y32 = jax.block_until_ready(prenorm_linear(x, gamma, beta, w_f32, bias))
    assert y32.shape == (B, N, D_out)
    assert jnp.allclose(y32, y_ref, atol=1e-4, rtol=1e-4)

    # bf16 I/O path (recommended, HBM-bound): bf16 x + bf16 W, f32 stats/acc.
    x_bf16 = x.astype(jnp.bfloat16)
    w_bf16 = w_f32.astype(jnp.bfloat16)
    y_ref16 = prenorm_linear_ref(x_bf16, gamma, beta, w_bf16, bias)
    y16 = jax.block_until_ready(prenorm_linear(x_bf16, gamma, beta, w_bf16, bias))
    assert y16.shape == (B, N, D_out)
    assert y16.dtype == jnp.bfloat16
    assert jnp.allclose(y16.astype(jnp.float32), y_ref16, atol=3e-2, rtol=3e-2)

    print("KERNEL_OK")
</pallas_src>

<mosaic_0001>
module attributes {stable_mosaic.version = 11 : i64} {
  func.func @_prenorm_fn_kernel(%arg0: i32, %arg1: memref<56x128xf32, #tpu.memory_space<vmem>>, %arg2: memref<1x128xf32, #tpu.memory_space<vmem>>, %arg3: memref<1x128xf32, #tpu.memory_space<vmem>>, %arg4: memref<128x128xf32, #tpu.memory_space<vmem>>, %arg5: memref<1x128xf32, #tpu.memory_space<vmem>>, %arg6: memref<56x128xf32, #tpu.memory_space<vmem>>) attributes {dimension_semantics = [#tpu.dimension_semantics<parallel>], iteration_bounds = array<i64: 8>, scalar_prefetch = 0 : i64, scratch_operands = 0 : i64, tpu.core_type = #tpu.core_type<tc>, window_params = [{transform_indices = @transform_0, window_bounds = array<i64: 56, 128>}, {pipeline_mode = #tpu.pipeline_mode<synchronous>, transform_indices = @transform_1, window_bounds = array<i64: 1, 128>}, {pipeline_mode = #tpu.pipeline_mode<synchronous>, transform_indices = @transform_2, window_bounds = array<i64: 1, 128>}, {pipeline_mode = #tpu.pipeline_mode<synchronous>, transform_indices = @transform_3, window_bounds = array<i64: 128, 128>}, {pipeline_mode = #tpu.pipeline_mode<synchronous>, transform_indices = @transform_4, window_bounds = array<i64: 1, 128>}, {transform_indices = @transform_5, window_bounds = array<i64: 56, 128>}]} {
    %c0 = arith.constant 0 : index
    %c0_0 = arith.constant 0 : index
    %0 = vector.load %arg1[%c0, %c0_0] : memref<56x128xf32, #tpu.memory_space<vmem>>, vector<56x128xf32>
    %cst = arith.constant dense<0.000000e+00> : vector<56xf32>
    %1 = vector.multi_reduction <add>, %0, %cst [1] : vector<56x128xf32> to vector<56xf32>
    %2 = vector.shape_cast %1 : vector<56xf32> to vector<56x1xf32>
    %cst_1 = arith.constant 7.812500e-03 : f32
    %3 = vector.broadcast %cst_1 : f32 to vector<56x1xf32>
    %4 = arith.mulf %2, %3 : vector<56x1xf32>
    %5 = vector.broadcast %4 : vector<56x1xf32> to vector<56x128xf32>
    %6 = arith.subf %0, %5 : vector<56x128xf32>
    %7 = arith.mulf %6, %6 : vector<56x128xf32>
    %cst_2 = arith.constant dense<0.000000e+00> : vector<56xf32>
    %8 = vector.multi_reduction <add>, %7, %cst_2 [1] : vector<56x128xf32> to vector<56xf32>
    %9 = vector.shape_cast %8 : vector<56xf32> to vector<56x1xf32>
    %cst_3 = arith.constant 7.812500e-03 : f32
    %10 = vector.broadcast %cst_3 : f32 to vector<56x1xf32>
    %11 = arith.mulf %9, %10 : vector<56x1xf32>
    %cst_4 = arith.constant 9.99999974E-6 : f32
    %12 = vector.broadcast %cst_4 : f32 to vector<56x1xf32>
    %13 = arith.addf %11, %12 : vector<56x1xf32>
    %14 = math.rsqrt %13 : vector<56x1xf32>
    %15 = vector.broadcast %14 : vector<56x1xf32> to vector<56x128xf32>
    %16 = arith.mulf %6, %15 : vector<56x128xf32>
    %c0_5 = arith.constant 0 : index
    %c0_6 = arith.constant 0 : index
    %17 = vector.load %arg2[%c0_5, %c0_6] : memref<1x128xf32, #tpu.memory_space<vmem>>, vector<1x128xf32>
    %18 = vector.broadcast %17 : vector<1x128xf32> to vector<56x128xf32>
    %19 = arith.mulf %16, %18 : vector<56x128xf32>
    %c0_7 = arith.constant 0 : index
    %c0_8 = arith.constant 0 : index
    %20 = vector.load %arg3[%c0_7, %c0_8] : memref<1x128xf32, #tpu.memory_space<vmem>>, vector<1x128xf32>
    %21 = vector.broadcast %20 : vector<1x128xf32> to vector<56x128xf32>
    %22 = arith.addf %19, %21 : vector<56x128xf32>
    %c0_9 = arith.constant 0 : index
    %c0_10 = arith.constant 0 : index
    %23 = vector.load %arg4[%c0_9, %c0_10] : memref<128x128xf32, #tpu.memory_space<vmem>>, vector<128x128xf32>
    %cst_11 = arith.constant dense<0.000000e+00> : vector<56x128xf32>
    %24 = tpu.matmul %22, %23, %cst_11 {dimension_numbers = #tpu.dot_dimension_numbers<[1], [0], [0], [1], [0, 0, 1, 1], [], []>} : vector<56x128xf32>, vector<128x128xf32>, vector<56x128xf32> -> vector<56x128xf32>
    %c0_12 = arith.constant 0 : index
    %c0_13 = arith.constant 0 : index
    %25 = vector.load %arg5[%c0_12, %c0_13] : memref<1x128xf32, #tpu.memory_space<vmem>>, vector<1x128xf32>
    %26 = vector.broadcast %25 : vector<1x128xf32> to vector<56x128xf32>
    %27 = arith.addf %24, %26 : vector<56x128xf32>
    %c0_14 = arith.constant 0 : index
    %c0_15 = arith.constant 0 : index
    %28 = vector.load %arg6[%c0_14, %c0_15] : memref<56x128xf32, #tpu.memory_space<vmem>>, vector<56x128xf32>
    tpu.vector_store %arg6[%c0_14, %c0_15], %27 {strides = array<i32>} : memref<56x128xf32, #tpu.memory_space<vmem>>, vector<56x128xf32>,
    return
  }
  func.func @transform_0(%arg0: i32) -> (i32, i32) {
    %c0_i32 = arith.constant 0 : i32
    %c0_i32_0 = arith.constant 0 : i32
    return %arg0, %c0_i32 : i32, i32
  }
  func.func @transform_1(%arg0: i32) -> (i32, i32) {
    %c0_i32 = arith.constant 0 : i32
    %c0_i32_0 = arith.constant 0 : i32
    %c0_i32_1 = arith.constant 0 : i32
    return %c0_i32, %c0_i32_0 : i32, i32
  }
  func.func @transform_2(%arg0: i32) -> (i32, i32) {
    %c0_i32 = arith.constant 0 : i32
    %c0_i32_0 = arith.constant 0 : i32
    %c0_i32_1 = arith.constant 0 : i32
    return %c0_i32, %c0_i32_0 : i32, i32
  }
  func.func @transform_3(%arg0: i32) -> (i32, i32) {
    %c0_i32 = arith.constant 0 : i32
    %c0_i32_0 = arith.constant 0 : i32
    %c0_i32_1 = arith.constant 0 : i32
    return %c0_i32, %c0_i32_0 : i32, i32
  }
  func.func @transform_4(%arg0: i32) -> (i32, i32) {
    %c0_i32 = arith.constant 0 : i32
    %c0_i32_0 = arith.constant 0 : i32
    %c0_i32_1 = arith.constant 0 : i32
    return %c0_i32, %c0_i32_0 : i32, i32
  }
  func.func @transform_5(%arg0: i32) -> (i32, i32) {
    %c0_i32 = arith.constant 0 : i32
    %c0_i32_0 = arith.constant 0 : i32
    return %arg0, %c0_i32 : i32, i32
  }
}

</mosaic_0001>

<bundles_post_ra>
// kernel: tpu_custom_call.1
= control target key start
LH: loop header
LB: loop body
LE: loop exit
PB: predicated region body
PF: predicated region fallthrough
CT: control target
= control target key end

     0   :  { %10 = vsyncpa [#allocation3], 0  ;;  %s1300_s0 = inlined_call_operand.hbm [shape: f32[394,128], index: 0, kind: input, shape index: {}]   ;;  %s1301_s1 = inlined_call_operand.vmem [shape: f32[1,128], index: 1, kind: input, shape index: {}]   ;;  %s1302_s2 = inlined_call_operand.vmem [shape: f32[1,128], index: 2, kind: input, shape index: {}]   ;;  %s1303_s3 = inlined_call_operand.hbm [shape: f32[128,128], index: 3, kind: input, shape index: {}]   ;;  %s1304_s4 = inlined_call_operand.vmem [shape: f32[1,128], index: 4, kind: input, shape index: {}]   ;;  %s1305_s5 = inlined_call_operand.hbm [shape: f32[394,128], index: 5, kind: output, shape index: {}]  }
   0x1   :  { %12 = vsyncpa [#allocation3 + $0x1], 0 }
   0x2   :  { %13 = vsyncpa [#allocation6], 0 }
   0x3   :  { %14 = vsyncpa [#allocation4], 0 }
   0x4   :  { %16 = vsyncpa [#allocation4 + $0x1], 0  ;;  %s1003_s18 = smov 0   ;;  %s1005_s19 = smov 0  }
   0x5   :  { %s1007_s20 = smov 0   ;;  %s1009_s21 = smov 0  }
   0x6 LB: > { %s1024_s22 = sadd.s32 4294967295, %s959_s21   ;;  %s619_s23 = sadd.s32 4294967294, %s959_s21   ;;  %s959_s21 = sphi %s1009_s21, %s1325_s21   ;;  %s955_s20 = sphi %s1007_s20, %s1324_s20   ;;  %s951_s19 = sphi %s1005_s19, %s1323_s19   ;;  %s947_s18 = sphi %s1003_s18, %s1322_s18  }
   0x7   : > { %s1028_s24 = sadd.s32 1, %s959_s21   ;;  %s29_s25 = sadd.s32 1, %s955_s20 }
   0x8   : > { %s26_s26 = ssub.s32 %s959_s21, %s1028_s24  ;;  %p36_p0 = scmp.ne.s32.totalorder %s955_s20, %s951_s19 }
   0x9   : > { %p27_p1 = scmp.eq.s32.totalorder %s26_s26, 0  ;;  %p37_p2 = scmp.eq.s32.totalorder %s959_s21, 0 }
   0xa   : > { %p42_p3 = scmp.ne.s32.totalorder %s951_s19, %s947_s18  ;;  %p1306_p4 = scmp.eq.s32.totalorder %s1024_s22, 0 }
   0xb   : > { %s1040_s27 = scalar_select %p27_p1, %s955_s20, %s29_s25  }
   0xc   : > { %p1042_p5 = por %p37_p2, %p36_p0  ;;  %p1048_p6 = por %p1306_p4, %p42_p3 }
   0xd   : > { %p150_p7 = scmp.eq.s32.totalorder %s1024_s22, 7  ;;  %p156_p8 = scmp.eq.s32.totalorder %s619_s23, 7 }
   0xe   : > { %s1309_s28 = scalar_select %p1042_p5, 1, 0 }
   0xf   : > { %s1310_s29 = scalar_select %p1048_p6, 1, 0 }
  0x10   : > { %p620_p9 = scmp.ge.s32.totalorder %s959_s21, 1  ;;  %p163_p10 = scmp.lt.s32.totalorder %s959_s21, 9 }
  0x11   : > { %p1055_p11 = por %p150_p7, %p36_p0  ;;  %p1059_p12 = por %p156_p8, %p42_p3 }
  0x12   : > { %p1063_p13 = pnand %p620_p9, %p163_p10  ;;  %s961_s8 = smov [#allocation5]  }
  0x13   : > { %s1311_s30 = scalar_select %p1055_p11, 1, 0 }
  0x14   : > { %s1312_s6 = scalar_select %p1059_p12, 1, 0 }
  0x15   : > { %s1313_s7 = scalar_select %p1063_p13, 1, 0 }
  0x16   : > { %p766_p1 = pneg %p1063_p13  ;;  %s181_s9 = sshll.u32 %s961_s8, 4  ;;  %s182_s9 = int_to_ptr.vmem [resolvable:$true] %s181_s9 }
  0x17   : > { %s833_s13 = scalar_lea.hbm %s1303_s3, 2048 }
  0x18   : > { %p1071_p2 = pnand %p766_p1, %p1306_p4  ;;  %p834_p0 = scmp.ne.s32.totalorder %s1303_s3, %s833_s13 }
  0x19   : > { %p840_p9 = scmp.lt.u32.totalorder %s833_s13, %s1303_s3 }
  0x1a   : > { %p835_p3 = pneg %p1071_p2 }
  0x1c   : > { %p836_p7 = pnand %p835_p3, %p834_p0 }
  0x1e   : > { %p837_p8 = pneg %p836_p7 }
  0x20   : > { %p842_p10 = pnand %p840_p9, %p837_p8 }
  0x22   : > { %845 = shalt.err (!%p842_p10)
}
  0x23   : > { %s846_s23 = scalar_lea.vmem %s182_s9, 2048  ;;  %p854_p11 = scmp.lt.s32.totalorder %s182_s9, %s182_s9 }
  0x24   : > { %p847_p1 = scmp.ne.s32.totalorder %s182_s9, %s846_s23  ;;  %p855_p6 = scmp.lt.s32.totalorder %s846_s23, %s846_s23 }
  0x26   : > { %p849_p4 = pnand %p847_p1, %p835_p3  ;;  %p856_p13 = por %p855_p6, %p854_p11 }
  0x28   : > { %p850_p12 = pneg %p849_p4 }
  0x2a   : > { %p857_p5 = pnand %p856_p13, %p850_p12 }
  0x2c   : > { %860 = shalt.err (!%p857_p5)
}
  0x2d   : > { %s962_s25 = smov 128   ;;  %s963_s26 = smov 8  }
  0x2e   : > { %769 = dma.hbm_to_vmem [thread:$0]  (!%p1071_p2), %s1303_s3, 2048, %s182_s9, [#allocation6], %s962_s25, %s962_s25, %s963_s26  }
  0x2f   : > { %p622_p0 = scmp.ge.s32.totalorder %s959_s21, 8 }
  0x30   : > { %p1315_p7 = scmp.ne.s32.totalorder (!%p622_p0), %s1309_s28, 0 }
  0x31   : > { %194 = sbr.rel (%p622_p0) target bundleno = 91 (0x5b), region = 32 }
  0x38   : > { %197 = sbr.rel (!%p1315_p7) target bundleno = 91 (0x5b), region = 36  ;;  %s198_s12 = sand.u32 (%p1315_p7), 1, %s955_s20  }
  0x39   : > { %s203_s13 = smul.u32 (%p1315_p7), 7, %s959_s21  ;;  %s1099_s17 = scalar_lea.sflag (%p1315_p7), [#allocation3], %s198_s12 }
  0x3a   : > { %s758_s14 = smul.u32 (%p1315_p7), 56, %s198_s12 }
  0x3b   : > { %s204_s15 = ssub.s32 (%p1315_p7), 50, %s203_s13 }
  0x3c   : > { %p205_p4 = scmp.lt.s32.totalorder (%p1315_p7), %s204_s15, 7  ;;  %s202_s9 = scalar_lea.vmem (%p1315_p7), [#allocation2], %s758_s14 }
  0x3f   : > { %s1327_s15 = smov (!%p205_p4, %s204_s15), 7 }
  0x40   : > { %s1096_s16 = sshll.u32 %s1327_s15, 7 }
  0x41   : > { %s209_s10 = ssub.s32 896, %s1096_s16 }
  0x42   : > { %210 = vsyncadd %s1099_s17, %s209_s10  ;;  %p624_p5 = scmp.ne.s32.totalorder %s1096_s16, 0  ;;  %s640_s28 = smul.u32 896, %s959_s21 }
  0x43   : > { %s215_s23 = sshll.u32 %s202_s9, 4  ;;  %s865_s14 = scalar_lea.hbm %s1300_s0, 6400  ;;  %s1109_s23 = int_to_ptr.vmem [resolvable:$true] %s215_s23 }
  0x44   : > { %s1107_s8 = scalar_lea.hbm %s1300_s0, %s640_s28 }
  0x45   : > { %s861_s11 = scalar_lea.hbm %s1107_s8, %s1096_s16  ;;  %p866_p13 = scmp.lt.u32.totalorder %s1107_s8, %s1300_s0 }
  0x46   : > { %p862_p6 = scmp.ne.s32.totalorder %s1107_s8, %s861_s11  ;;  %p867_p2 = scmp.lt.u32.totalorder %s865_s14, %s861_s11 }
  0x47   : > { %p869_p8 = scmp.lt.u32.totalorder %s861_s11, %s1107_s8 }
  0x48   : > { %p863_p11 = pnand %p862_p6, %p624_p5  ;;  %p868_p3 = por %p867_p2, %p866_p13 }
  0x4a   : > { %p864_p12 = pneg %p863_p11  ;;  %p870_p9 = por %p869_p8, %p868_p3 }
  0x4c   : > { %p871_p10 = pnand %p870_p9, %p864_p12 }
  0x4e   : > { %874 = shalt.err (!%p871_p10)
}
  0x4f   : > { %s875_s9 = scalar_lea.vmem %s1109_s23, %s1096_s16  ;;  %s964_s28 = smov [#allocation2]  }
  0x50   : > { %p876_p1 = scmp.ne.s32.totalorder %s1109_s23, %s875_s9  ;;  %s879_s25 = sshll.u32 %s964_s28, 4  ;;  %s880_s25 = int_to_ptr.vmem [resolvable:$false] %s879_s25 }
  0x51   : > { %s881_s26 = scalar_lea.vmem %s880_s25, 1792  ;;  %p882_p4 = scmp.lt.s32.totalorder %s1109_s23, %s880_s25 }
  0x52   : > { %p877_p0 = pnand %p876_p1, %p624_p5  ;;  %p883_p6 = scmp.lt.s32.totalorder %s881_s26, %s875_s9 }
  0x54   : > { %p878_p7 = pneg %p877_p0  ;;  %p884_p11 = por %p883_p6, %p882_p4 }
  0x56   : > { %p885_p13 = pnand %p884_p11, %p878_p7 }
  0x58   : > { %888 = shalt.err (!%p885_p13)
}
  0x59   : > { %s965_s11 = smov 128   ;;  %s966_s12 = smov 8  }
  0x5a   : > { %221 = dma.hbm_to_vmem [thread:$0]  (%p624_p5), %s1107_s8, %s1096_s16, %s1109_s23, %s1099_s17, %s965_s11, %s965_s11, %s966_s12  }
  0x5b PF: > { %p1316_p12 = scmp.ne.s32.totalorder %s1313_s7, 0 }
  0x5c   : > { %s1139_s13 = sand.u32 (!%p1316_p12), 1, %s951_s19   ;;  %p1317_p2 = scmp.ne.s32.totalorder (!%p1316_p12), %s1310_s29, 0 }
  0x5d   : > { %227 = sbr.rel (%p1316_p12) target bundleno = 672 (0x2a0), region = 40  ;;  %s230_s15 = scalar_lea.sflag (!%p1316_p12), [#allocation3], %s1139_s13 }
  0x5e   : > { %s759_s14 = smul.u32 (!%p1316_p12), 56, %s1139_s13 }
  0x60   : > { %s233_s10 = scalar_lea.vmem (!%p1316_p12), [#allocation2], %s759_s14 }
  0x64   : > { %934 = dma.done.wait (%p1317_p2), %s230_s15, 896  }
  0x65   : > { %936 = vsyncadd (%p1317_p2), %s230_s15, 4294966400  ;;  %p1318_p5 = scmp.eq.s32.totalorder %s1024_s22, 0 }
  0x67   : > { %938 = dma.done.wait (%p1318_p5), [#allocation6], 2048   ;;  %p1319_p3 = pmov %p1318_p5 }
  0x68   : > { %v274_v0 = vld [vmem:[%s233_s10] sm:$0xff]  ;;  %v275_v2 = vld [vmem:[%s233_s10 + $0x8] sm:$0xff]  ;;  %v276_v3 = vld [vmem:[%s233_s10 + $0x10] sm:$0xff]  ;;  %v967_v10 = vmov 0.0|0.0   ;;  %vm968_vm0 = vmmov 0   ;;  %v969_v60 = vmov 0.0  }
  0x69   : > { %940 = vsyncadd (%p1319_p3), [#allocation6], 4294965248  ;;  %v278_v1 = vld [vmem:[%s233_s10 + $0x20] sm:$0xff]  ;;  %281 = vadd.xlane.f32.xlu0 %v274_v0  ;;  %v279_v4 = vld [vmem:[%s233_s10 + $0x28] sm:$0xff]  ;;  %718 = vmatprep.subr.bf16.mxu0 %v967_v10  ;;  %s1229_s9 = scalar_lea.vmem [#allocation7], %s759_s14  ;;  %s517_s28 = scalar_lea.sflag [#allocation4], %s1139_s13 }
  0x6a   : > { %289 = vadd.xlane.f32.xlu1 %v278_v1  ;;  %v277_v5 = vld [vmem:[%s233_s10 + $0x18] sm:$0xff]  ;;  %v280_v6 = vld [vmem:[%s233_s10 + $0x30] sm:$0xff]  ;;  %v388_v9 = vld [vmem:[#allocation5 + $0x10] sm:$0xff]  ;;  %742 = vmatprep.subr.bf16.mxu1 %v967_v10  ;;  %p1320_p8 = scmp.ne.s32.totalorder %s1311_s30, 0 }
  0x6b   : > { %v386_v7 = vld [vmem:[#allocation5] sm:$0xff]  ;;  %v387_v8 = vld [vmem:[#allocation5 + $0x8] sm:$0xff]  ;;  %v389_v12 = vld [vmem:[#allocation5 + $0x18] sm:$0xff]  ;;  %697 = vmatprep.mubr.msk.f32.mxu0 %vm968_vm0, %v969_v60  ;;  %709 = vmatprep.mubr.msk.f32.mxu1 %vm968_vm0, %v969_v60  ;;  %s524_s25 = smul.u32 (%p1320_p8), 7, %s1024_s22 }
  0x6c   : > { %v719_v11 = vpack.c.bf16 %v387_v8, %v386_v7  ;;  %v722_v13 = vpack.c.bf16 %v389_v12, %v388_v9  ;;  %v390_v14 = vld [vmem:[#allocation5 + $0x20] sm:$0xff]  ;;  %v391_v15 = vld [vmem:[#allocation5 + $0x28] sm:$0xff]  ;;  %v392_v45 = vld [vmem:[#allocation5 + $0x30] sm:$0xff] }
  0x6d   : > { %283 = vadd.xlane.f32.xlu0 %v275_v2  ;;  %v725_v16 = vpack.c.bf16 %v391_v15, %v390_v14  ;;  %v393_v46 = vld [vmem:[#allocation5 + $0x38] sm:$0xff]  ;;  %v394_v48 = vld [vmem:[#allocation5 + $0x40] sm:$0xff]  ;;  %v395_v49 = vld [vmem:[#allocation5 + $0x48] sm:$0xff]  ;;  %s525_s26 = ssub.s32 (%p1320_p8), 50, %s524_s25 }
  0x6e   : > { %285 = vadd.xlane.f32.xlu1 %v276_v3  ;;  %720 = vmatpush3.bf16.msra.mxu0 %v719_v11  ;;  %v728_v47 = vpack.c.bf16 %v393_v46, %v392_v45  ;;  %v731_v50 = vpack.c.bf16 %v395_v49, %v394_v48  ;;  %v396_v51 = vld [vmem:[#allocation5 + $0x50] sm:$0xff]  ;;  %v397_v52 = vld [vmem:[#allocation5 + $0x58] sm:$0xff]  ;;  %v398_v54 = vld [vmem:[#allocation5 + $0x60] sm:$0xff]  ;;  %p526_p9 = scmp.lt.s32.totalorder (%p1320_p8), %s525_s26, 7 }
  0x6f   : > { %750 = vmatpush3.bf16.msra.mxu1 %v719_v11  ;;  %721 = vmatprep.subr.bf16.mxu0 %v967_v10  ;;  %v734_v53 = vpack.c.bf16 %v397_v52, %v396_v51  ;;  %v399_v55 = vld [vmem:[#allocation5 + $0x68] sm:$0xff]  ;;  %v400_v57 = vld [vmem:[#allocation5 + $0x70] sm:$0xff]  ;;  %v401_v58 = vld [vmem:[#allocation5 + $0x78] sm:$0xff] }
  0x70   : > { %743 = vmatprep.subr.bf16.mxu1 %v967_v10  ;;  %v737_v56 = vpack.c.bf16 %v399_v55, %v398_v54  ;;  %v740_v59 = vpack.c.bf16 %v401_v58, %v400_v57 }
  0x71   : > { %291 = vadd.xlane.f32.xlu0 %v279_v4 }
  0x72   : > { %287 = vadd.xlane.f32.xlu1 %v277_v5  ;;  %723 = vmatpush3.bf16.msra.mxu0 %v722_v13 }
  0x73   : > { %751 = vmatpush3.bf16.msra.mxu1 %v722_v13  ;;  %724 = vmatprep.subr.bf16.mxu0 %v967_v10 }
  0x74   : > { %744 = vmatprep.subr.bf16.mxu1 %v967_v10 }
  0x75   : > { %293 = vadd.xlane.f32.xlu0 %v280_v6 }
  0x76   : > { %726 = vmatpush3.bf16.msra.mxu0 %v725_v16 }
  0x77   : > { %752 = vmatpush3.bf16.msra.mxu1 %v725_v16  ;;  %727 = vmatprep.subr.bf16.mxu0 %v967_v10 }
  0x78   : > { %745 = vmatprep.subr.bf16.mxu1 %v967_v10 }
  0x7a   : > { %729 = vmatpush3.bf16.msra.mxu0 %v728_v47 }
  0x7b   : > { %753 = vmatpush3.bf16.msra.mxu1 %v728_v47  ;;  %730 = vmatprep.subr.bf16.mxu0 %v967_v10 }
  0x7c   : > { %746 = vmatprep.subr.bf16.mxu1 %v967_v10 }
  0x7e   : > { %732 = vmatpush3.bf16.msra.mxu0 %v731_v50 }
  0x7f   : > { %754 = vmatpush3.bf16.msra.mxu1 %v731_v50  ;;  %733 = vmatprep.subr.bf16.mxu0 %v967_v10 }
  0x80   : > { %747 = vmatprep.subr.bf16.mxu1 %v967_v10 }
  0x82   : > { %735 = vmatpush3.bf16.msra.mxu0 %v734_v53 }
  0x83   : > { %755 = vmatpush3.bf16.msra.mxu1 %v734_v53  ;;  %736 = vmatprep.subr.bf16.mxu0 %v967_v10 }
  0x84   : > { %748 = vmatprep.subr.bf16.mxu1 %v967_v10 }
  0x86   : > { %738 = vmatpush3.bf16.msra.mxu0 %v737_v56 }
  0x87   : > { %756 = vmatpush3.bf16.msra.mxu1 %v737_v56  ;;  %739 = vmatprep.subr.bf16.mxu0 %v967_v10 }
  0x88   : > { %749 = vmatprep.subr.bf16.mxu1 %v967_v10 }
  0x8a   : > { %741 = vmatpush3.bf16.msra.mxu0 %v740_v59 }
  0x8b   : > { %757 = vmatpush3.bf16.msra.mxu1 %v740_v59 }
  0xf6   : > { %v282_v17 = vpop.xlane.xlu0 %281 }
  0xf7   : > { %v290_v18 = vpop.xlane.xlu1 %289  ;;  %v295_v19 = vmul.f32 0.0078125, %v282_v17 }
  0xf8   : > { %v299_v20 = vmul.f32 0.0078125, %v290_v18 }
  0xf9   : > { %v1161_v21 = vsub.f32 %v274_v0, %v295_v19  ;;  %v630_v19 = vld [vmem:[%s1301_s1] ss:$0 sm:$0xff] }
  0xfa   : > { %v1163_v22 = vsub.f32 %v278_v1, %v299_v20  ;;  %v284_v23 = vpop.xlane.xlu0 %283 }
  0xfb   : > { %v286_v24 = vpop.xlane.xlu1 %285  ;;  %v296_v25 = vmul.f32 0.0078125, %v284_v23  ;;  %v309_v26 = vmul.f32 %v1161_v21, %v1161_v21  ;;  %v631_v23 = vld [vmem:[%s1302_s2] ss:$0 sm:$0xff] }
  0xfc   : > { %v297_v27 = vmul.f32 0.0078125, %v286_v24  ;;  %v313_v30 = vmul.f32 %v1163_v22, %v1163_v22 }
  0xfd   : > { %v1167_v28 = vsub.f32 %v275_v2, %v296_v25  ;;  %316 = vadd.xlane.f32.xlu1 %v309_v26 }
  0xfe   : > { %v1169_v29 = vsub.f32 %v276_v3, %v297_v27  ;;  %v292_v31 = vpop.xlane.xlu0 %291 }
  0xff   : > { %v288_v32 = vpop.xlane.xlu1 %287  ;;  %v300_v33 = vmul.f32 0.0078125, %v292_v31  ;;  %v310_v34 = vmul.f32 %v1167_v28, %v1167_v28 }
 0x100   : > { %v298_v35 = vmul.f32 0.0078125, %v288_v32  ;;  %v311_v38 = vmul.f32 %v1169_v29, %v1169_v29 }
 0x101   : > { %v1175_v36 = vsub.f32 %v279_v4, %v300_v33  ;;  %324 = vadd.xlane.f32.xlu1 %v313_v30  ;;  %318 = vadd.xlane.f32.xlu0 %v310_v34 }
 0x102   : > { %v1177_v37 = vsub.f32 %v277_v5, %v298_v35  ;;  %v294_v39 = vpop.xlane.xlu0 %293 }
 0x103   : > { %v301_v40 = vmul.f32 0.0078125, %v294_v39  ;;  %v314_v41 = vmul.f32 %v1175_v36, %v1175_v36 }
 0x104   : > { %v312_v43 = vmul.f32 %v1177_v37, %v1177_v37 }
 0x105   : > { %v1183_v42 = vsub.f32 %v280_v6, %v301_v40  ;;  %320 = vadd.xlane.f32.xlu0 %v311_v38  ;;  %326 = vadd.xlane.f32.xlu1 %v314_v41 }
 0x107   : > { %v315_v44 = vmul.f32 %v1183_v42, %v1183_v42 }
 0x109   : > { %322 = vadd.xlane.f32.xlu0 %v312_v43  ;;  %328 = vadd.xlane.f32.xlu1 %v315_v44 }
 0x18a   : > { %v317_v61 = vpop.xlane.xlu1 %316 }
 0x18b   : > { %v330_v62 = vmul.f32 0.0078125, %v317_v61 }
 0x18d   : > { %v337_v63 = vadd.f32 1e-05, %v330_v62 }
 0x18e   : > { %v325_v0 = vpop.xlane.xlu1 %324  ;;  %v319_v1 = vpop.xlane.xlu0 %318 }
 0x18f   : > { %819 = vrsqrt.f32 %v337_v63  ;;  %v334_v2 = vmul.f32 0.0078125, %v325_v0  ;;  %v331_v3 = vmul.f32 0.0078125, %v319_v1 }
 0x191   : > { %v341_v4 = vadd.f32 1e-05, %v334_v2  ;;  %v338_v5 = vadd.f32 1e-05, %v331_v3 }
 0x192   : > { %v327_v6 = vpop.xlane.xlu1 %326  ;;  %v321_v7 = vpop.xlane.xlu0 %320 }
 0x193   : > { %821 = vrsqrt.f32 %v341_v4  ;;  %v335_v8 = vmul.f32 0.0078125, %v327_v6  ;;  %v332_v9 = vmul.f32 0.0078125, %v321_v7 }
 0x194   : > { %823 = vrsqrt.f32 %v338_v5 }
 0x195   : > { %v342_v10 = vadd.f32 1e-05, %v335_v8  ;;  %v339_v11 = vadd.f32 1e-05, %v332_v9 }
 0x196   : > { %v329_v12 = vpop.xlane.xlu1 %328  ;;  %v323_v13 = vpop.xlane.xlu0 %322 }
 0x197   : > { %825 = vrsqrt.f32 %v342_v10  ;;  %v336_v14 = vmul.f32 0.0078125, %v329_v12  ;;  %v333_v15 = vmul.f32 0.0078125, %v323_v13 }
 0x198   : > { %827 = vrsqrt.f32 %v339_v11 }
 0x199   : > { %v820_v16 = vpop.eup %819  ;;  %v343_v17 = vadd.f32 1e-05, %v336_v14  ;;  %v340_v18 = vadd.f32 1e-05, %v333_v15 }
 0x19a   : > { %v351_v20 = vmul.f32 %v820_v16, %v1161_v21 }
 0x19b   : > { %829 = vrsqrt.f32 %v343_v17 }
 0x19c   : > { %831 = vrsqrt.f32 %v340_v18  ;;  %v365_v24 = vmul.f32 %v630_v19, %v351_v20 }
 0x19d   : > { %v822_v25 = vpop.eup %821 }
 0x19e   : > { %v824_v26 = vpop.eup %823  ;;  %v379_v27 = vadd.f32 %v631_v23, %v365_v24  ;;  %v355_v30 = vmul.f32 %v822_v25, %v1163_v22 }
 0x19f   : > { %v352_v31 = vmul.f32 %v824_v26, %v1167_v28 }
 0x1a0   : > { %698 = vmatmul.mubr.f32.vlgmr.msra.gmra.mrb[0].mxu0 %v379_v27  ;;  %v369_v32 = vmul.f32 %v630_v19, %v355_v30 }
 0x1a1   : > { %v826_v33 = vpop.eup %825  ;;  %700 = vmatprep.mubr.msk.f32.mxu0 %vm968_vm0, %v969_v60  ;;  %v366_v21 = vmul.f32 %v630_v19, %v352_v31 }
 0x1a2   : > { %v828_v34 = vpop.eup %827  ;;  %v383_v35 = vadd.f32 %v631_v23, %v369_v32  ;;  %v356_v38 = vmul.f32 %v826_v33, %v1175_v36 }
 0x1a3   : > { %v380_v39 = vadd.f32 %v631_v23, %v366_v21  ;;  %v353_v40 = vmul.f32 %v828_v34, %v1169_v29 }
 0x1a4   : > { %710 = vmatmul.mubr.f32.vlgmr.msra.gmra.mrb[0].mxu1 %v383_v35  ;;  %v370_v41 = vmul.f32 %v630_v19, %v356_v38 }
 0x1a5   : > { %v830_v43 = vpop.eup %829  ;;  %701 = vmatmul.mubr.f32.gmra.mrb[2].mxu0 %v380_v39  ;;  %712 = vmatprep.mubr.msk.f32.mxu1 %vm968_vm0, %v969_v60  ;;  %v367_v22 = vmul.f32 %v630_v19, %v353_v40 }
 0x1a6   : > { %v832_v28 = vpop.eup %831  ;;  %703 = vmatprep.mubr.msk.f32.mxu0 %vm968_vm0, %v969_v60  ;;  %v384_v44 = vadd.f32 %v631_v23, %v370_v41  ;;  %v357_v45 = vmul.f32 %v830_v43, %v1183_v42  ;;  %v632_v42 = vld [vmem:[%s1304_s4] ss:$0 sm:$0xff] }
 0x1a7   : > { %v381_v46 = vadd.f32 %v631_v23, %v367_v22  ;;  %v354_v36 = vmul.f32 %v832_v28, %v1177_v37 }
 0x1a8   : > { %713 = vmatmul.mubr.f32.gmra.mrb[2].mxu1 %v384_v44  ;;  %v371_v29 = vmul.f32 %v630_v19, %v357_v45 }
 0x1a9   : > { %704 = vmatmul.mubr.f32.gmra.mrb[4].mxu0 %v381_v46  ;;  %715 = vmatprep.mubr.msk.f32.mxu1 %vm968_vm0, %v969_v60  ;;  %v368_v47 = vmul.f32 %v630_v19, %v354_v36 }
 0x1aa   : > { %706 = vmatprep.mubr.msk.f32.mxu0 %vm968_vm0, %v969_v60  ;;  %v385_v48 = vadd.f32 %v631_v23, %v371_v29 }
 0x1ab   : > { %v382_v49 = vadd.f32 %v631_v23, %v368_v47 }
 0x1ac   : > { %716 = vmatmul.mubr.f32.gmra.mrb[4].mxu1 %v385_v48 }
 0x1ad   : > { %707 = vmatmul.mubr.f32.gmra.mrb[6].mxu0 %v382_v49 }
 0x273   : > { %v475_v50 = vpop.f32.mrb[0].mxu0 }
 0x274   : > { %v476_v37 = vadd.f32 %v632_v42, %v475_v50  ;;  %v699_v51 = vpop.f32.mrb[1].mxu0 }
 0x276   : > { %509 = vst [vmem:[%s1229_s9] sm:$0xff] %v476_v37 }
 0x277   : > { %v495_v52 = vpop.f32.mrb[0].mxu1 }
 0x278   : > { %v480_v53 = vpop.f32.mrb[2].mxu0  ;;  %v496_v54 = vadd.f32 %v632_v42, %v495_v52  ;;  %v711_v55 = vpop.f32.mrb[1].mxu1 }
 0x279   : > { %v481_v56 = vadd.f32 %v632_v42, %v480_v53  ;;  %v702_v57 = vpop.f32.mrb[3].mxu0 }
 0x27a   : > { %513 = vst [vmem:[%s1229_s9 + $0x20] sm:$0xff] %v496_v54 }
 0x27b   : > { %510 = vst [vmem:[%s1229_s9 + $0x8] sm:$0xff] %v481_v56  ;;  %v500_v58 = vpop.f32.mrb[2].mxu1 }
 0x27c   : > { %v485_v59 = vpop.f32.mrb[4].mxu0  ;;  %v501_v60 = vadd.f32 %v632_v42, %v500_v58  ;;  %v714_v61 = vpop.f32.mrb[3].mxu1 }
 0x27d   : > { %v486_v62 = vadd.f32 %v632_v42, %v485_v59  ;;  %v705_v63 = vpop.f32.mrb[5].mxu0  ;;  %523 = sbr.rel (!%p1320_p8) target bundleno = 672 (0x2a0), region = 52 }
 0x27e   : > { %514 = vst [vmem:[%s1229_s9 + $0x28] sm:$0xff] %v501_v60 }
 0x27f   : > { %511 = vst [vmem:[%s1229_s9 + $0x10] sm:$0xff] %v486_v62  ;;  %v505_v0 = vpop.f32.mrb[4].mxu1 }
 0x280   : > { %v490_v1 = vpop.f32.mrb[6].mxu0  ;;  %v506_v2 = vadd.f32 %v632_v42, %v505_v0  ;;  %v717_v3 = vpop.f32.mrb[5].mxu1 }
 0x281   : > { %v491_v4 = vadd.f32 %v632_v42, %v490_v1  ;;  %v708_v5 = vpop.f32.mrb[7].mxu0 }
 0x282   : > { %515 = vst [vmem:[%s1229_s9 + $0x30] sm:$0xff] %v506_v2 }
 0x283   : > { %512 = vst [vmem:[%s1229_s9 + $0x18] sm:$0xff] %v491_v4 }
 0x284   : > { %s1329_s26 = smov (!%p526_p9, %s525_s26), 7 }
 0x285   : > { %s1242_s11 = sshll.u32 %s1329_s26, 7 }
 0x286   : > { %s530_s12 = ssub.s32 896, %s1242_s11 }
 0x287   : > { %531 = vsyncadd %s517_s28, %s530_s12  ;;  %p634_p10 = scmp.ne.s32.totalorder %s1242_s11, 0  ;;  %s641_s30 = smul.u32 896, %s1024_s22 }
 0x288   : > { %s536_s14 = sshll.u32 %s1229_s9, 4  ;;  %s970_s16 = smov [#allocation7]   ;;  %s1255_s14 = int_to_ptr.vmem [resolvable:$true] %s536_s14 }
 0x289   : > { %s1253_s29 = scalar_lea.hbm %s1305_s5, %s641_s30  ;;  %s889_s7 = scalar_lea.vmem %s1255_s14, %s1242_s11 }
 0x28a   : > { %p890_p1 = scmp.ne.s32.totalorder %s1255_s14, %s889_s7  ;;  %s893_s17 = sshll.u32 %s970_s16, 4  ;;  %s894_s17 = int_to_ptr.vmem [resolvable:$false] %s893_s17 }
 0x28b   : > { %s895_s22 = scalar_lea.vmem %s894_s17, 1792  ;;  %p896_p4 = scmp.lt.s32.totalorder %s1255_s14, %s894_s17 }
 0x28c   : > { %p891_p0 = pnand %p890_p1, %p634_p10  ;;  %p897_p6 = scmp.lt.s32.totalorder %s895_s22, %s889_s7 }
 0x28e   : > { %p892_p7 = pneg %p891_p0  ;;  %p898_p11 = por %p897_p6, %p896_p4 }
 0x290   : > { %p899_p13 = pnand %p898_p11, %p892_p7 }
 0x292   : > { %902 = shalt.err (!%p899_p13)
}
 0x293   : > { %s903_s23 = scalar_lea.hbm %s1253_s29, %s1242_s11  ;;  %s907_s25 = scalar_lea.hbm %s1305_s5, 6400 }
 0x294   : > { %p904_p12 = scmp.ne.s32.totalorder %s1253_s29, %s903_s23  ;;  %p908_p3 = scmp.lt.u32.totalorder %s1253_s29, %s1305_s5 }
 0x295   : > { %p909_p8 = scmp.lt.u32.totalorder %s907_s25, %s903_s23  ;;  %p911_p1 = scmp.lt.u32.totalorder %s903_s23, %s1253_s29 }
 0x296   : > { %p905_p2 = pnand %p904_p12, %p634_p10 }
 0x297   : > { %p910_p9 = por %p909_p8, %p908_p3 }
 0x298   : > { %p906_p5 = pneg %p905_p2 }
 0x299   : > { %p912_p0 = por %p911_p1, %p910_p9 }
 0x29b   : > { %p913_p7 = pnand %p912_p0, %p906_p5 }
 0x29d   : > { %916 = shalt.err (!%p913_p7)
}
 0x29e   : > { %s971_s30 = smov 128   ;;  %s972_s15 = smov 8  }
 0x29f   : > { %542 = dma.vmem_to_hbm [thread:$0]  (%p634_p10), %s1255_s14, %s1242_s11, %s1253_s29, %s517_s28, %s971_s30, %s971_s30, %s972_s15  }
 0x2a0 PF: > { %p776_p4 = scmp.ge.s32.totalorder %s959_s21, 2  ;;  %s551_s10 = sand.u32 1, %s947_s18  }
 0x2a1   : > { %p1321_p6 = scmp.ne.s32.totalorder %s1312_s6, 0  ;;  %s552_s7 = scalar_lea.sflag [#allocation4], %s551_s10 }
 0x2a3   : > { %p771_p11 = pnand %p776_p4, %p1321_p6 }
 0x2a5   : > { %942 = dma.done.wait (!%p771_p11), %s552_s7, 896  }
 0x2a6   : > { %944 = vsyncadd (!%p771_p11), %s552_s7, 4294966400  ;;  %p19_p13 = scmp.ge.s32.totalorder %s1028_s24, 10   ;;  %s1322_s18 = smov %s951_s19 }
 0x2a7   : > { %s1323_s19 = smov %s955_s20  ;;  %s1324_s20 = smov %s1040_s27 }
 0x2a8   : > { %s1325_s21 = smov %s1028_s24  ;;  %21 = sbr.rel (!%p19_p13) target bundleno = 6 (0x6), region = 89 }
 0x2af   :  { %557 = vsyncpa [#allocation3], 1 }
 0x2b0   :  { %559 = vsyncpa [#allocation3 + $0x1], 1 }
 0x2b1   :  { %560 = vsyncpa [#allocation6], 1 }
 0x2b2   :  { %561 = vsyncpa [#allocation4], 1 }
 0x2b3   :  { %563 = vsyncpa [#allocation4 + $0x1], 1 }

</bundles_post_ra>
